<compile_context>
chip_gen: v6e
topology: v6e:2x2x1
jax: 0.10.0
libtpu: 0.0.40
codegen_flags: <defaults>
</compile_context>

<pallas_src>
import numpy as np
import jax
import jax.numpy as jnp
from jax.experimental import pallas as pl
from jax.experimental.pallas import tpu as pltpu


# ---------------------------------------------------------------------------
# Parameter / buffer construction (deterministic, mirrors __init__)
# ---------------------------------------------------------------------------
def legendre_basis(coef_dim: int, length: int) -> jnp.ndarray:
    """L[i, :] = sqrt(2*i + 1) * P_i(x),  x = linspace(-1, 1, length).

    Built in float64 (numpy, construction-time only) and cast to f32 once so
    high-order scaled-Legendre rows stay accurate for large coef_dim.
    """
    x = np.linspace(-1.0, 1.0, length, dtype=np.float64)
    polys = [np.ones_like(x)]                       # P_0
    if coef_dim > 1:
        polys.append(x)                             # P_1
    # Bonnet recurrence: (n+1) P_{n+1}(x) = (2n+1) x P_n(x) - n P_{n-1}(x)
    for n in range(1, coef_dim - 1):
        polys.append(((2.0 * n + 1.0) * x * polys[n] - n * polys[n - 1]) / (n + 1.0))
    L = np.stack(polys[:coef_dim], axis=0)
    scale = np.sqrt(2.0 * np.arange(coef_dim, dtype=np.float64) + 1.0)
    return jnp.asarray(L * scale[:, None], dtype=jnp.float32)


def hippo_A_B(coef_dim: int):
    """A, B buffers (registered in __init__; unused by forward)."""
    A = jnp.diag(jnp.arange(1, coef_dim + 1, dtype=jnp.float32))
    B = jnp.sqrt(2.0 * jnp.arange(coef_dim, dtype=jnp.float32) + 1.0)
    A = A + jnp.tril(B[:, None] * B[None, :], k=-1)
    return A, B


def _cdiv(a: int, b: int) -> int:
    return -(-a // b)


def _round_up(x: int, m: int) -> int:
    return _cdiv(x, m) * m


# ---------------------------------------------------------------------------
# Pallas kernel: (tm, coef_dim) row tile x (coef_dim, tn) L tile -> (tm, tn)
# ---------------------------------------------------------------------------
def _recon_kernel(coef_ref, l_ref, out_ref):
    out_ref[...] = jnp.dot(
        coef_ref[...], l_ref[...], preferred_element_type=jnp.float32
    ).astype(out_ref.dtype)


def hippo_legs_forward(
    coef: jnp.ndarray,
    L: jnp.ndarray,
    length=None,
    *,
    compute_dtype=jnp.float32,          # f32 default: matches PyTorch numerics
    out_dtype=None,                     # None -> coef.dtype; bf16 halves HBM writes
    block_rows: int = 1024,
    n_block_max: int = 2048,            # lanes per output tile (multiple of 128)
    vmem_budget_bytes: int = 24 << 20,  # double-buffered tile budget (v7x-safe)
    min_pallas_rows: int = 0,
) -> jnp.ndarray:
    """Pallas implementation of HiPPOLegS.forward.

    coef: (batch, n_channels, coef_dim)
    L:    (coef_dim, full_length)
    """
    full_length = L.shape[1]
    if length is None:
        length = full_length
    length = min(int(length), full_length)

    batch, n_channels, coef_dim = coef.shape
    rows = batch * n_channels
    if out_dtype is None:
        out_dtype = coef.dtype

    # Tiny-problem guard: below this, pallas_call fixed overhead dominates.
    if rows < min_pallas_rows:
        out = jnp.einsum(
            "bci,ij->bcj",
            coef.astype(compute_dtype),
            L[:, :length].astype(compute_dtype),
            preferred_element_type=jnp.float32,
        )
        return out.astype(out_dtype)

    in_bytes = jnp.dtype(compute_dtype).itemsize
    out_bytes = jnp.dtype(out_dtype).itemsize
    # Sublane alignment for the narrowest dtype involved (8 f32 / 16 bf16).
    row_align = max(8, 32 // min(in_bytes, out_bytes))

    # --- N tiling: keep L / out tiles lane-dense; full length when small ----
    tn = length if length <= n_block_max else n_block_max
    n_tiles = _cdiv(length, tn)

    # --- M tiling: VMEM-budget aware, balanced, >=2 tiles for v7x dual-TC ---
    l_buf = 2 * coef_dim * tn * in_bytes                       # L double-buffer
    per_row = 2 * (tn * out_bytes + coef_dim * in_bytes)       # out + coef, x2
    tm_cap = max(
        row_align,
        ((vmem_budget_bytes - l_buf) // per_row) // row_align * row_align,
    )
    tm = min(block_rows, tm_cap, _round_up(rows, row_align))
    m_tiles = _cdiv(rows, tm)
    if rows >= 2 * row_align:
        m_tiles = max(m_tiles, 2)         # keep both v7x TensorCores busy
    tm = min(tm, _round_up(_cdiv(rows, m_tiles), row_align))
    m_tiles = _cdiv(rows, tm)

    coef2d = coef.reshape(rows, coef_dim).astype(compute_dtype)
    L_used = (L if length == full_length else L[:, :length]).astype(compute_dtype)

    footprint = l_buf + per_row * tm
    vmem_limit = int(min(48 << 20, max(footprint + (4 << 20), 32 << 20)))

    cost = pl.CostEstimate(
        flops=2 * rows * coef_dim * length,
        transcendentals=0,
        bytes_accessed=in_bytes * (rows * coef_dim + coef_dim * length)
        + out_bytes * rows * length,
    )

    out2d = pl.pallas_call(
        _recon_kernel,
        out_shape=jax.ShapeDtypeStruct((rows, length), out_dtype),
        grid=(m_tiles, n_tiles),
        in_specs=[
            pl.BlockSpec((tm, coef_dim), lambda i, j: (i, 0)),   # coef row tile
            pl.BlockSpec((coef_dim, tn), lambda i, j: (0, j)),   # L column tile
        ],
        out_specs=pl.BlockSpec((tm, tn), lambda i, j: (i, j)),
        compiler_params=pltpu.CompilerParams(
            dimension_semantics=("parallel", "parallel"),
            vmem_limit_bytes=vmem_limit,
        ),
        cost_estimate=cost,
    )(coef2d, L_used)

    # Contiguous split of the leading dim: metadata-only, no extra HBM pass.
    return out2d.reshape(batch, n_channels, length)


# TODO(synk): fit_coef (sequential HiPPO recurrence over timesteps / C++ path)
# is not part of forward() and is not implemented here.


# ---------------------------------------------------------------------------
# Driver
# ---------------------------------------------------------------------------
if __name__ == "__main__":
    key = jax.random.PRNGKey(0)
    k1, k2 = jax.random.split(key)

    # --- Test 1: f32 path, non-128-multiple `length` slice, single tile -----
    batch, n_channels, coef_dim, module_length = 2, 4, 32, 128
    A, B = hippo_A_B(coef_dim)              # parity with __init__ (unused by forward)
    L = legendre_basis(coef_dim, module_length)
    coef = jax.random.normal(k1, (batch, n_channels, coef_dim), dtype=jnp.float32)

    out = hippo_legs_forward(coef, L, length=100)
    out = jax.block_until_ready(out)
    ref = jnp.einsum("bci,ij->bcj", coef, L)[..., :100]
    assert out.shape == (batch, n_channels, 100)
    assert out.dtype == jnp.float32
    assert jnp.allclose(out, ref, atol=1e-4, rtol=1e-4)

    # --- Test 2: bf16 compute + bf16 output, multi-row-tile grid with a
    #     partial last row tile and a non-128-multiple output width ----------
    batch2, n_channels2, length2 = 6, 50, 200     # rows=300 -> 3 balanced tiles
    L2 = legendre_basis(coef_dim, length2)
    coef2 = jax.random.normal(k2, (batch2, n_channels2, coef_dim), dtype=jnp.float32)

    out2 = hippo_legs_forward(
        coef2, L2,
        compute_dtype=jnp.bfloat16,
        out_dtype=jnp.bfloat16,
        block_rows=128,
    )
    out2 = jax.block_until_ready(out2)
    ref2 = jnp.einsum(
        "bci,ij->bcj",
        coef2.astype(jnp.bfloat16),
        L2.astype(jnp.bfloat16),
        preferred_element_type=jnp.float32,
    )
    assert out2.shape == (batch2, n_channels2, length2)
    assert out2.dtype == jnp.bfloat16
    assert jnp.allclose(out2.astype(jnp.float32), ref2, atol=0.25, rtol=0.05)

    print("KERNEL_OK")
</pallas_src>

<mosaic_0001>
module attributes {stable_mosaic.version = 11 : i64} {
  func.func @_recon_kernel(%arg0: i32, %arg1: i32, %arg2: memref<8x32xf32, #tpu.memory_space<vmem>>, %arg3: memref<32x100xf32, #tpu.memory_space<vmem>>, %arg4: memref<8x100xf32, #tpu.memory_space<vmem>>) attributes {dimension_semantics = [#tpu.dimension_semantics<parallel>, #tpu.dimension_semantics<parallel>], iteration_bounds = array<i64: 1, 1>, scalar_prefetch = 0 : i64, scratch_operands = 0 : i64, tpu.core_type = #tpu.core_type<tc>, window_params = [{transform_indices = @transform_0, window_bounds = array<i64: 8, 32>}, {transform_indices = @transform_1, window_bounds = array<i64: 32, 100>}, {transform_indices = @transform_2, window_bounds = array<i64: 8, 100>}]} {
    %c0 = arith.constant 0 : index
    %c0_0 = arith.constant 0 : index
    %0 = vector.load %arg2[%c0, %c0_0] : memref<8x32xf32, #tpu.memory_space<vmem>>, vector<8x32xf32>
    %c0_1 = arith.constant 0 : index
    %c0_2 = arith.constant 0 : index
    %1 = vector.load %arg3[%c0_1, %c0_2] : memref<32x100xf32, #tpu.memory_space<vmem>>, vector<32x100xf32>
    %cst = arith.constant dense<0.000000e+00> : vector<8x100xf32>
    %2 = tpu.matmul %0, %1, %cst {dimension_numbers = #tpu.dot_dimension_numbers<[1], [0], [0], [1], [0, 0, 1, 1], [], []>} : vector<8x32xf32>, vector<32x100xf32>, vector<8x100xf32> -> vector<8x100xf32>
    %c0_3 = arith.constant 0 : index
    %c0_4 = arith.constant 0 : index
    %3 = vector.load %arg4[%c0_3, %c0_4] : memref<8x100xf32, #tpu.memory_space<vmem>>, vector<8x100xf32>
    tpu.vector_store %arg4[%c0_3, %c0_4], %2 {strides = array<i32>} : memref<8x100xf32, #tpu.memory_space<vmem>>, vector<8x100xf32>,
    return
  }
  func.func @transform_0(%arg0: i32, %arg1: i32) -> (i32, i32) {
    %c0_i32 = arith.constant 0 : i32
    %c0_i32_0 = arith.constant 0 : i32
    return %arg0, %c0_i32 : i32, i32
  }
  func.func @transform_1(%arg0: i32, %arg1: i32) -> (i32, i32) {
    %c0_i32 = arith.constant 0 : i32
    %c0_i32_0 = arith.constant 0 : i32
    return %c0_i32, %arg1 : i32, i32
  }
  func.func @transform_2(%arg0: i32, %arg1: i32) -> (i32, i32) {
    %c0_i32 = arith.constant 0 : i32
    return %arg0, %arg1 : i32, i32
  }
}

</mosaic_0001>

<bundles_post_ra>
// kernel: tpu_custom_call.1
= control target key start
LH: loop header
LB: loop body
LE: loop exit
PB: predicated region body
PF: predicated region fallthrough
CT: control target
= control target key end

     0   :  { %7 = vsyncpa [#allocation3], 0  ;;  %s256_s0 = inlined_call_operand.hbm [shape: f32[8,32], index: 0, kind: input, shape index: {}]   ;;  %s257_s1 = inlined_call_operand.hbm [shape: f32[32,100], index: 1, kind: input, shape index: {}]   ;;  %s258_s2 = inlined_call_operand.hbm [shape: f32[8,100], index: 2, kind: output, shape index: {}]  }
   0x1   :  { %8 = vsyncpa [#allocation6], 0 }
   0x2   :  { %9 = vsyncpa [#allocation4], 0  ;;  %s225_s9 = smov [#allocation2]   ;;  %s226_s11 = smov [#allocation5]  }
   0x3   :  { %s16_s10 = sshll.u32 %s225_s9, 4  ;;  %s25_s12 = sshll.u32 %s226_s11, 4  ;;  %s17_s10 = int_to_ptr.vmem [resolvable:$true] %s16_s10  ;;  %s26_s12 = int_to_ptr.vmem [resolvable:$true] %s25_s12 }
   0x4   :  { %s167_s13 = scalar_lea.vmem %s17_s10, 128  ;;  %p172_p1 = scmp.lt.s32.totalorder %s17_s10, %s17_s10 }
   0x5   :  { %p168_p0 = scmp.ne.s32.totalorder %s17_s10, %s167_s13  ;;  %p173_p2 = scmp.lt.s32.totalorder %s167_s13, %s167_s13 }
   0x7   :  { %p174_p3 = por %p173_p2, %p172_p1 }
   0x9   :  { %p175_p4 = pnand %p174_p3, %p168_p0 }
   0xb   :  { %178 = shalt.err (!%p175_p4)
}
   0xc   :  { %19 = dma.hbm_to_vmem [thread:$0]  %s256_s0, 128, %s17_s10, [#allocation3]  }
   0xd   :  { %s187_s16 = scalar_lea.vmem %s26_s12, 512  ;;  %p192_p6 = scmp.lt.s32.totalorder %s26_s12, %s26_s12 }
   0xe   :  { %p188_p5 = scmp.ne.s32.totalorder %s26_s12, %s187_s16  ;;  %p193_p7 = scmp.lt.s32.totalorder %s187_s16, %s187_s16 }
  0x10   :  { %p194_p8 = por %p193_p7, %p192_p6 }
  0x12   :  { %p195_p9 = pnand %p194_p8, %p188_p5 }
  0x14   :  { %198 = shalt.err (!%p195_p9)
}
  0x15   :  { %s227_s17 = smov 128   ;;  %s228_s18 = smov 8  }
  0x16   :  { %31 = dma.hbm_to_vmem [thread:$0]  %s257_s1, 512, %s26_s12, [#allocation6], %s227_s17, %s227_s17, %s228_s18  }
  0x17   :  { %219 = dma.done.wait [#allocation3], 128  }
  0x18   :  { %220 = vsyncadd [#allocation3], 4294967168 }
  0x19   :  { %221 = dma.done.wait [#allocation6], 512  }
  0x1a   :  { %222 = vsyncadd [#allocation6], 4294966784  ;;  %v229_v0 = vmov 0.0   ;;  %vm230_vm0 = vmmov 0   ;;  %v42_v1 = vld [vmem:[#allocation5 + $0x18] sm:$0xff]  ;;  %v41_v2 = vld [vmem:[#allocation5 + $0x10] sm:$0xff] }
  0x1b   :  { %141 = vmatprep.subr.mxu0 %v229_v0  ;;  %149 = vmatprep.mubr.msk.f32.mxu0 %vm230_vm0, %v229_v0  ;;  %v40_v3 = vld [vmem:[#allocation5 + $0x8] sm:$0xff]  ;;  %v39_v4 = vld [vmem:[#allocation5] sm:$0xff]  ;;  %v38_v5 = vld [vmem:[#allocation2] sm:$0xff]  ;;  %vm43_vm1 = vcmask 261120   ;;  %s231_s0 = smov [#allocation7]   ;;  %vm117_vm2 = vcmask 818176  }
  0x1c   :  { %142 = vmatpush3.msra.mxu0 %v42_v1  ;;  %s125_s1 = sshll.u32 %s231_s0, 4  ;;  %s126_s1 = int_to_ptr.vmem [resolvable:$true] %s125_s1 }
  0x1d   :  { %143 = vmatprep.subr.mxu0 %v229_v0  ;;  %s199_s21 = scalar_lea.vmem %s126_s1, 128  ;;  %p204_p11 = scmp.lt.s32.totalorder %s126_s1, %s126_s1 }
  0x1e   :  { %144 = vmatpush3.msra.mxu0 %v41_v2  ;;  %p200_p10 = scmp.ne.s32.totalorder %s126_s1, %s199_s21  ;;  %p205_p12 = scmp.lt.s32.totalorder %s199_s21, %s199_s21 }
  0x1f   :  { %145 = vmatprep.subr.mxu0 %v229_v0 }
  0x20   :  { %146 = vmatpush3.msra.mxu0 %v40_v3  ;;  %p206_p13 = por %p205_p12, %p204_p11 }
  0x21   :  { %147 = vmatprep.subr.mxu0 %v229_v0 }
  0x22   :  { %148 = vmatpush3.msra.mxu0 %v39_v4  ;;  %p207_p0 = pnand %p206_p13, %p200_p10 }
  0x23   :  { %150 = vmatmul.mubr.msk.f32.vlgmr.msra.gmra.mxu0 %vm43_vm1, %v38_v5 }
  0xe3   :  { %v113_v6 = vpop.f32.mrf.mxu0 }
  0xe4   :  { %118 = vst.msk [vmem:[#allocation7] sm:$0xff] %vm117_vm2, %v113_v6 }
  0xe5   :  { %v151_v7 = vpop.f32.mrf.mxu0 }
  0xe6   :  { %210 = shalt.err (!%p207_p0)
}
  0xe7   :  { %128 = dma.vmem_to_hbm [thread:$0]  %s126_s1, 128, %s258_s2, [#allocation4]  }
  0xe8   :  { %223 = dma.done.wait [#allocation4], 128  }
  0xe9   :  { %224 = vsyncadd [#allocation4], 4294967168 }
  0xea   :  { %132 = vsyncpa [#allocation3], 1 }
  0xeb   :  { %133 = vsyncpa [#allocation6], 1 }
  0xec   :  { %134 = vsyncpa [#allocation4], 1 }

</bundles_post_ra>
